<compile_context>
chip_gen: v6e
topology: v6e:2x2x1
jax: 0.10.0
libtpu: 0.0.40
codegen_flags: <defaults>
</compile_context>

<pallas_src>
import jax
import jax.numpy as jnp
from jax import lax
from jax.experimental import pallas as pl
from jax.experimental.pallas import tpu as pltpu

HIDDEN_SIZE = 2
INPUT_SIZE = 6
OUTPUT_SIZE = 1
SEQUENCE_SIZE = 16
IN_FEATURES = INPUT_SIZE * SEQUENCE_SIZE  # 96

# Offsets of the packed small weights/biases inside the SMEM scalar array.
# 2x2 weights are stored row-major in (in, out) order: [w00, w01, w10, w11].
_W2, _W3, _W4 = 0, 4, 8
_W5 = 12                               # (2,1): [w00, w10]
_B1, _B2, _B3, _B4 = 14, 16, 18, 20
_B5 = 22
_N_SCALARS = 23

_CHUNK = 1024  # inner lane-slice width: keeps live (1, chunk) f32 rows well under 64 vregs


def _make_kernel(chunk, n_chunks):
    """Builds the kernel for a given static tile decomposition."""

    def kernel(scal_ref, w1t_ref, x_ref, o_ref):
        # scal_ref: (23,) f32 SMEM; w1t_ref: (2, 96); x_ref: (tb, 96); o_ref: (1, tb).
        w1t = w1t_ref[...]
        s = [scal_ref[i] for i in range(_N_SCALARS)]  # hoist SMEM scalar loads

        def compute(xc):
            # Layer 1 (96 -> 2) on the MXU, contracting the feature axis of both
            # operands (x stays in its natural (rows, 96) layout; batch lands on lanes).
            h = lax.dot_general(w1t, xc, (((1,), (1,)), ((), ())),
                                preferred_element_type=jnp.float32)        # (2, rows)
            h0 = jnp.maximum(h[0:1, :] + s[_B1 + 0], 0.0)                  # (1, rows)
            h1 = jnp.maximum(h[1:2, :] + s[_B1 + 1], 0.0)                  # (1, rows)
            # Layers 2-4 (2 -> 2, ReLU) on the VPU: scalar-broadcast multiply-adds.
            for w_off, b_off in ((_W2, _B2), (_W3, _B3), (_W4, _B4)):
                n0 = jnp.maximum(
                    s[w_off + 0] * h0 + s[w_off + 2] * h1 + s[b_off + 0], 0.0)
                n1 = jnp.maximum(
                    s[w_off + 1] * h0 + s[w_off + 3] * h1 + s[b_off + 1], 0.0)
                h0, h1 = n0, n1
            # Layer 5 (2 -> 1), no activation.
            return s[_W5 + 0] * h0 + s[_W5 + 1] * h1 + s[_B5]

        if n_chunks == 1:
            o_ref[...] = compute(x_ref[...]).astype(o_ref.dtype)
        else:
            def body(c, carry):
                start = pl.multiple_of(c * chunk, chunk)
                out = compute(x_ref[pl.ds(start, chunk), :])
                o_ref[:, pl.ds(start, chunk)] = out.astype(o_ref.dtype)
                return carry
            lax.fori_loop(0, n_chunks, body, None, unroll=False)

    return kernel


def _pack_scalars(params):
    return jnp.concatenate([
        params["w2"].reshape(-1), params["w3"].reshape(-1), params["w4"].reshape(-1),
        params["w5"].reshape(-1),
        params["b1"].reshape(-1), params["b2"].reshape(-1), params["b3"].reshape(-1),
        params["b4"].reshape(-1), params["b5"].reshape(-1),
    ]).astype(jnp.float32)


def _round_up(a, m):
    return ((a + m - 1) // m) * m


def transition_model_forward(x, params, *, block_b=4096):
    """x: (B, 96), f32 (or bf16 only if the producer already emits bf16).
    params: dict of (in, out) weights and (1, out) biases."""
    B, F = x.shape
    assert F == IN_FEATURES

    w1t = params["w1"].T.astype(x.dtype)   # (2, 96): tiny, resident across grid steps
    scal = _pack_scalars(params)           # (23,) f32 -> SMEM via scalar prefetch

    # Batch tile selection:
    #   * whole batch for small B (single block, lanes fully used);
    #   * otherwise at least 2 grid steps (both v7x TCs get work; free on v5e/v6e),
    #     capped at block_b, multiple of 128, and rounded so the inner chunk loop
    #     divides the tile exactly.
    if B <= 256:
        tb = B
    else:
        tb = min(block_b, _round_up(pl.cdiv(B, 2), 128))
        if tb > _CHUNK:
            tb = _round_up(tb, _CHUNK)
    chunk = min(tb, _CHUNK)
    n_chunks = tb // chunk
    grid = (pl.cdiv(B, tb),)

    # VMEM sized from the chosen tile (double-buffered x block + output + headroom).
    x_block_bytes = tb * IN_FEATURES * x.dtype.itemsize
    vmem_limit = int(max(16 * 1024 * 1024, 4 * x_block_bytes))

    flops = 2 * B * (IN_FEATURES * HIDDEN_SIZE
                     + 3 * HIDDEN_SIZE * HIDDEN_SIZE
                     + HIDDEN_SIZE * OUTPUT_SIZE)
    bytes_accessed = (x.size * x.dtype.itemsize
                      + w1t.size * w1t.dtype.itemsize
                      + _N_SCALARS * 4
                      + B * OUTPUT_SIZE * 4)

    out_t = pl.pallas_call(
        _make_kernel(chunk, n_chunks),
        out_shape=jax.ShapeDtypeStruct((OUTPUT_SIZE, B), jnp.float32),
        grid_spec=pltpu.PrefetchScalarGridSpec(
            num_scalar_prefetch=1,
            grid=grid,
            in_specs=[
                # w1^T stays resident (constant block index across the batch grid).
                pl.BlockSpec((HIDDEN_SIZE, IN_FEATURES), lambda i, s: (0, 0)),
                # x in its natural (B, 96) layout -> no wrapper-side HBM transpose pass.
                pl.BlockSpec((tb, IN_FEATURES), lambda i, s: (i, 0)),
            ],
            out_specs=pl.BlockSpec((OUTPUT_SIZE, tb), lambda i, s: (0, i)),
        ),
        compiler_params=pltpu.CompilerParams(
            dimension_semantics=("parallel",),
            vmem_limit_bytes=vmem_limit,
        ),
        cost_estimate=pl.CostEstimate(
            flops=flops, transcendentals=0, bytes_accessed=bytes_accessed),
    )(scal, w1t, x)

    # (1, B) -> (B, 1): contiguous reshape, no data movement.
    return out_t.reshape(B, OUTPUT_SIZE)


def init_params(key):
    """Deterministic init: uniform(-1/sqrt(fan_in), 1/sqrt(fan_in)) like nn.Linear default."""
    dims = [
        (IN_FEATURES, HIDDEN_SIZE),
        (HIDDEN_SIZE, HIDDEN_SIZE),
        (HIDDEN_SIZE, HIDDEN_SIZE),
        (HIDDEN_SIZE, HIDDEN_SIZE),
        (HIDDEN_SIZE, OUTPUT_SIZE),
    ]
    params = {}
    for i, (fan_in, fan_out) in enumerate(dims, start=1):
        key, kw, kb = jax.random.split(key, 3)
        bound = 1.0 / jnp.sqrt(jnp.float32(fan_in))
        params[f"w{i}"] = jax.random.uniform(
            kw, (fan_in, fan_out), jnp.float32, minval=-bound, maxval=bound)
        params[f"b{i}"] = jax.random.uniform(
            kb, (1, fan_out), jnp.float32, minval=-bound, maxval=bound)
    return params


def reference_forward(x, params):
    h = x
    for i in range(1, 5):
        h = jnp.maximum(h @ params[f"w{i}"] + params[f"b{i}"], 0.0)
    return h @ params["w5"] + params["b5"]


if __name__ == "__main__":
    key = jax.random.PRNGKey(0)
    key, kx = jax.random.split(key)
    params = init_params(key)

    # Small-batch path (single block, whole batch on the lanes).
    B = 8
    x = jax.random.normal(kx, (B, IN_FEATURES), jnp.float32)
    out = jax.block_until_ready(transition_model_forward(x, params))
    ref = reference_forward(x, params)
    assert out.shape == (B, OUTPUT_SIZE), out.shape
    assert jnp.allclose(out, ref, atol=1e-4, rtol=1e-4), (out, ref)

    # Multi-step grid + in-kernel chunk loop + partial tail block
    # (B=2500, block_b=2048 -> tb=2048, 2 chunks/step, grid=2, last block partial).
    key, kx2 = jax.random.split(key)
    B2 = 2500
    x2 = jax.random.normal(kx2, (B2, IN_FEATURES), jnp.float32)
    out2 = jax.block_until_ready(transition_model_forward(x2, params, block_b=2048))
    ref2 = reference_forward(x2, params)
    assert out2.shape == (B2, OUTPUT_SIZE), out2.shape
    assert jnp.allclose(out2, ref2, atol=1e-4, rtol=1e-4), "multi-block mismatch"

    # bf16-input path (used only when the producer already emits bf16; no wrapper cast
    # is performed for f32 inputs).  Compare against the f32 reference on bf16-rounded x/w1.
    out_bf = jax.block_until_ready(
        transition_model_forward(x.astype(jnp.bfloat16), params))
    params_q = dict(params)
    params_q["w1"] = params["w1"].astype(jnp.bfloat16).astype(jnp.float32)
    ref_bf = reference_forward(x.astype(jnp.bfloat16).astype(jnp.float32), params_q)
    assert jnp.allclose(out_bf, ref_bf, atol=2e-3, rtol=2e-3), (out_bf, ref_bf)

    print("KERNEL_OK")
</pallas_src>

<mosaic_0001>
module attributes {stable_mosaic.version = 11 : i64} {
  func.func @kernel(%arg0: i32, %arg1: memref<23xf32, #tpu.memory_space<smem>>, %arg2: memref<2x96xf32, #tpu.memory_space<vmem>>, %arg3: memref<8x96xf32, #tpu.memory_space<vmem>>, %arg4: memref<1x8xf32, #tpu.memory_space<vmem>>) attributes {dimension_semantics = [#tpu.dimension_semantics<parallel>], iteration_bounds = array<i64: 1>, scalar_prefetch = 1 : i64, scratch_operands = 0 : i64, tpu.core_type = #tpu.core_type<tc>, window_params = [{pipeline_mode = #tpu.pipeline_mode<synchronous>, transform_indices = @transform_0, window_bounds = array<i64: 2, 96>}, {transform_indices = @transform_1, window_bounds = array<i64: 8, 96>}, {transform_indices = @transform_2, window_bounds = array<i64: 1, 8>}]} {
    %c0 = arith.constant 0 : index
    %c0_0 = arith.constant 0 : index
    %0 = vector.load %arg2[%c0, %c0_0] : memref<2x96xf32, #tpu.memory_space<vmem>>, vector<2x96xf32>
    %c0_1 = arith.constant 0 : index
    %1 = memref.load %arg1[%c0_1] : memref<23xf32, #tpu.memory_space<smem>>
    %c1 = arith.constant 1 : index
    %2 = memref.load %arg1[%c1] : memref<23xf32, #tpu.memory_space<smem>>
    %c2 = arith.constant 2 : index
    %3 = memref.load %arg1[%c2] : memref<23xf32, #tpu.memory_space<smem>>
    %c3 = arith.constant 3 : index
    %4 = memref.load %arg1[%c3] : memref<23xf32, #tpu.memory_space<smem>>
    %c4 = arith.constant 4 : index
    %5 = memref.load %arg1[%c4] : memref<23xf32, #tpu.memory_space<smem>>
    %c5 = arith.constant 5 : index
    %6 = memref.load %arg1[%c5] : memref<23xf32, #tpu.memory_space<smem>>
    %c6 = arith.constant 6 : index
    %7 = memref.load %arg1[%c6] : memref<23xf32, #tpu.memory_space<smem>>
    %c7 = arith.constant 7 : index
    %8 = memref.load %arg1[%c7] : memref<23xf32, #tpu.memory_space<smem>>
    %c8 = arith.constant 8 : index
    %9 = memref.load %arg1[%c8] : memref<23xf32, #tpu.memory_space<smem>>
    %c9 = arith.constant 9 : index
    %10 = memref.load %arg1[%c9] : memref<23xf32, #tpu.memory_space<smem>>
    %c10 = arith.constant 10 : index
    %11 = memref.load %arg1[%c10] : memref<23xf32, #tpu.memory_space<smem>>
    %c11 = arith.constant 11 : index
    %12 = memref.load %arg1[%c11] : memref<23xf32, #tpu.memory_space<smem>>
    %c12 = arith.constant 12 : index
    %13 = memref.load %arg1[%c12] : memref<23xf32, #tpu.memory_space<smem>>
    %c13 = arith.constant 13 : index
    %14 = memref.load %arg1[%c13] : memref<23xf32, #tpu.memory_space<smem>>
    %c14 = arith.constant 14 : index
    %15 = memref.load %arg1[%c14] : memref<23xf32, #tpu.memory_space<smem>>
    %c15 = arith.constant 15 : index
    %16 = memref.load %arg1[%c15] : memref<23xf32, #tpu.memory_space<smem>>
    %c16 = arith.constant 16 : index
    %17 = memref.load %arg1[%c16] : memref<23xf32, #tpu.memory_space<smem>>
    %c17 = arith.constant 17 : index
    %18 = memref.load %arg1[%c17] : memref<23xf32, #tpu.memory_space<smem>>
    %c18 = arith.constant 18 : index
    %19 = memref.load %arg1[%c18] : memref<23xf32, #tpu.memory_space<smem>>
    %c19 = arith.constant 19 : index
    %20 = memref.load %arg1[%c19] : memref<23xf32, #tpu.memory_space<smem>>
    %c20 = arith.constant 20 : index
    %21 = memref.load %arg1[%c20] : memref<23xf32, #tpu.memory_space<smem>>
    %c21 = arith.constant 21 : index
    %22 = memref.load %arg1[%c21] : memref<23xf32, #tpu.memory_space<smem>>
    %c22 = arith.constant 22 : index
    %23 = memref.load %arg1[%c22] : memref<23xf32, #tpu.memory_space<smem>>
    %c0_2 = arith.constant 0 : index
    %c0_3 = arith.constant 0 : index
    %24 = vector.load %arg3[%c0_2, %c0_3] : memref<8x96xf32, #tpu.memory_space<vmem>>, vector<8x96xf32>
    %cst = arith.constant dense<0.000000e+00> : vector<2x8xf32>
    %25 = tpu.matmul %0, %24, %cst {dimension_numbers = #tpu.dot_dimension_numbers<[1], [1], [0], [0], [0, 0, 1, 0], [], []>} : vector<2x96xf32>, vector<8x96xf32>, vector<2x8xf32> -> vector<2x8xf32>
    %26 = vector.extract_strided_slice %25 {offsets = [0, 0], sizes = [1, 8], strides = [1, 1]} : vector<2x8xf32> to vector<1x8xf32>
    %27 = vector.broadcast %15 : f32 to vector<1x8xf32>
    %28 = arith.addf %26, %27 : vector<1x8xf32>
    %cst_4 = arith.constant 0.000000e+00 : f32
    %29 = vector.broadcast %cst_4 : f32 to vector<1x8xf32>
    %30 = arith.maximumf %28, %29 : vector<1x8xf32>
    %31 = vector.extract_strided_slice %25 {offsets = [1, 0], sizes = [1, 8], strides = [1, 1]} : vector<2x8xf32> to vector<1x8xf32>
    %32 = vector.broadcast %16 : f32 to vector<1x8xf32>
    %33 = arith.addf %31, %32 : vector<1x8xf32>
    %cst_5 = arith.constant 0.000000e+00 : f32
    %34 = vector.broadcast %cst_5 : f32 to vector<1x8xf32>
    %35 = arith.maximumf %33, %34 : vector<1x8xf32>
    %36 = vector.broadcast %1 : f32 to vector<1x8xf32>
    %37 = arith.mulf %36, %30 : vector<1x8xf32>
    %38 = vector.broadcast %3 : f32 to vector<1x8xf32>
    %39 = arith.mulf %38, %35 : vector<1x8xf32>
    %40 = arith.addf %37, %39 : vector<1x8xf32>
    %41 = vector.broadcast %17 : f32 to vector<1x8xf32>
    %42 = arith.addf %40, %41 : vector<1x8xf32>
    %cst_6 = arith.constant 0.000000e+00 : f32
    %43 = vector.broadcast %cst_6 : f32 to vector<1x8xf32>
    %44 = arith.maximumf %42, %43 : vector<1x8xf32>
    %45 = vector.broadcast %2 : f32 to vector<1x8xf32>
    %46 = arith.mulf %45, %30 : vector<1x8xf32>
    %47 = vector.broadcast %4 : f32 to vector<1x8xf32>
    %48 = arith.mulf %47, %35 : vector<1x8xf32>
    %49 = arith.addf %46, %48 : vector<1x8xf32>
    %50 = vector.broadcast %18 : f32 to vector<1x8xf32>
    %51 = arith.addf %49, %50 : vector<1x8xf32>
    %cst_7 = arith.constant 0.000000e+00 : f32
    %52 = vector.broadcast %cst_7 : f32 to vector<1x8xf32>
    %53 = arith.maximumf %51, %52 : vector<1x8xf32>
    %54 = vector.broadcast %5 : f32 to vector<1x8xf32>
    %55 = arith.mulf %54, %44 : vector<1x8xf32>
    %56 = vector.broadcast %7 : f32 to vector<1x8xf32>
    %57 = arith.mulf %56, %53 : vector<1x8xf32>
    %58 = arith.addf %55, %57 : vector<1x8xf32>
    %59 = vector.broadcast %19 : f32 to vector<1x8xf32>
    %60 = arith.addf %58, %59 : vector<1x8xf32>
    %cst_8 = arith.constant 0.000000e+00 : f32
    %61 = vector.broadcast %cst_8 : f32 to vector<1x8xf32>
    %62 = arith.maximumf %60, %61 : vector<1x8xf32>
    %63 = vector.broadcast %6 : f32 to vector<1x8xf32>
    %64 = arith.mulf %63, %44 : vector<1x8xf32>
    %65 = vector.broadcast %8 : f32 to vector<1x8xf32>
    %66 = arith.mulf %65, %53 : vector<1x8xf32>
    %67 = arith.addf %64, %66 : vector<1x8xf32>
    %68 = vector.broadcast %20 : f32 to vector<1x8xf32>
    %69 = arith.addf %67, %68 : vector<1x8xf32>
    %cst_9 = arith.constant 0.000000e+00 : f32
    %70 = vector.broadcast %cst_9 : f32 to vector<1x8xf32>
    %71 = arith.maximumf %69, %70 : vector<1x8xf32>
    %72 = vector.broadcast %9 : f32 to vector<1x8xf32>
    %73 = arith.mulf %72, %62 : vector<1x8xf32>
    %74 = vector.broadcast %11 : f32 to vector<1x8xf32>
    %75 = arith.mulf %74, %71 : vector<1x8xf32>
    %76 = arith.addf %73, %75 : vector<1x8xf32>
    %77 = vector.broadcast %21 : f32 to vector<1x8xf32>
    %78 = arith.addf %76, %77 : vector<1x8xf32>
    %cst_10 = arith.constant 0.000000e+00 : f32
    %79 = vector.broadcast %cst_10 : f32 to vector<1x8xf32>
    %80 = arith.maximumf %78, %79 : vector<1x8xf32>
    %81 = vector.broadcast %10 : f32 to vector<1x8xf32>
    %82 = arith.mulf %81, %62 : vector<1x8xf32>
    %83 = vector.broadcast %12 : f32 to vector<1x8xf32>
    %84 = arith.mulf %83, %71 : vector<1x8xf32>
    %85 = arith.addf %82, %84 : vector<1x8xf32>
    %86 = vector.broadcast %22 : f32 to vector<1x8xf32>
    %87 = arith.addf %85, %86 : vector<1x8xf32>
    %cst_11 = arith.constant 0.000000e+00 : f32
    %88 = vector.broadcast %cst_11 : f32 to vector<1x8xf32>
    %89 = arith.maximumf %87, %88 : vector<1x8xf32>
    %90 = vector.broadcast %13 : f32 to vector<1x8xf32>
    %91 = arith.mulf %90, %80 : vector<1x8xf32>
    %92 = vector.broadcast %14 : f32 to vector<1x8xf32>
    %93 = arith.mulf %92, %89 : vector<1x8xf32>
    %94 = arith.addf %91, %93 : vector<1x8xf32>
    %95 = vector.broadcast %23 : f32 to vector<1x8xf32>
    %96 = arith.addf %94, %95 : vector<1x8xf32>
    %c0_12 = arith.constant 0 : index
    %c0_13 = arith.constant 0 : index
    %97 = vector.load %arg4[%c0_12, %c0_13] : memref<1x8xf32, #tpu.memory_space<vmem>>, vector<1x8xf32>
    tpu.vector_store %arg4[%c0_12, %c0_13], %96 {strides = array<i32>} : memref<1x8xf32, #tpu.memory_space<vmem>>, vector<1x8xf32>,
    return
  }
  func.func @transform_0(%arg0: i32, %arg1: memref<23xf32, #tpu.memory_space<smem>>) -> (i32, i32) {
    %c0_i32 = arith.constant 0 : i32
    %c0_i32_0 = arith.constant 0 : i32
    %c0_i32_1 = arith.constant 0 : i32
    return %c0_i32, %c0_i32_0 : i32, i32
  }
  func.func @transform_1(%arg0: i32, %arg1: memref<23xf32, #tpu.memory_space<smem>>) -> (i32, i32) {
    %c0_i32 = arith.constant 0 : i32
    %c0_i32_0 = arith.constant 0 : i32
    return %arg0, %c0_i32 : i32, i32
  }
  func.func @transform_2(%arg0: i32, %arg1: memref<23xf32, #tpu.memory_space<smem>>) -> (i32, i32) {
    %c0_i32 = arith.constant 0 : i32
    %c0_i32_0 = arith.constant 0 : i32
    return %c0_i32, %arg0 : i32, i32
  }
}

</mosaic_0001>

<bundles_post_ra>
// kernel: tpu_custom_call.1
= control target key start
LH: loop header
LB: loop body
LE: loop exit
PB: predicated region body
PF: predicated region fallthrough
CT: control target
= control target key end

     0   :  { %s341_s12 = smov [#allocation3]   ;;  %s397_s0 = inlined_call_operand.hbm [shape: f32[23], index: 0, kind: input, shape index: {}]   ;;  %s398_s1 = inlined_call_operand.hbm [shape: f32[2,96], index: 1, kind: input, shape index: {}]   ;;  %s399_s2 = inlined_call_operand.hbm [shape: f32[8,96], index: 2, kind: input, shape index: {}]   ;;  %s400_s3 = inlined_call_operand.hbm [shape: f32[1,8], index: 3, kind: output, shape index: {}]  }
   0x1   :  { %9 = dma.hbm_to_smem %s397_s0, 16, %s341_s12, [#allocation2] }
   0x2   :  { %333 = dma.done.wait [#allocation2], 16 }
   0x3   :  { %334 = vsyncadd [#allocation2], 4294967280 }
   0x4   :  { %11 = sfence }
   0x5   :  { %12 = vsyncpa [#allocation5], 0 }
   0x6   :  { %13 = vsyncpa [#allocation8], 0 }
   0x7   :  { %14 = vsyncpa [#allocation6], 0  ;;  %s342_s15 = smov [#allocation4]   ;;  %s343_s17 = smov [#allocation7]  }
   0x8   :  { %s21_s16 = sshll.u32 %s342_s15, 4  ;;  %s31_s18 = sshll.u32 %s343_s17, 4  ;;  %s22_s16 = int_to_ptr.vmem [resolvable:$true] %s21_s16  ;;  %s32_s18 = int_to_ptr.vmem [resolvable:$true] %s31_s18 }
   0x9   :  { %s281_s19 = scalar_lea.vmem %s22_s16, 32  ;;  %p286_p1 = scmp.lt.s32.totalorder %s22_s16, %s22_s16 }
   0xa   :  { %p282_p0 = scmp.ne.s32.totalorder %s22_s16, %s281_s19  ;;  %p287_p2 = scmp.lt.s32.totalorder %s281_s19, %s281_s19 }
   0xc   :  { %p288_p3 = por %p287_p2, %p286_p1 }
   0xe   :  { %p289_p4 = pnand %p288_p3, %p282_p0 }
  0x10   :  { %292 = shalt.err (!%p289_p4)
}
  0x11   :  { %24 = dma.hbm_to_vmem [thread:$0]  %s398_s1, 32, %s22_s16, [#allocation5]  }
  0x12   :  { %s301_s21 = scalar_lea.vmem %s32_s18, 128  ;;  %p306_p6 = scmp.lt.s32.totalorder %s32_s18, %s32_s18 }
  0x13   :  { %p302_p5 = scmp.ne.s32.totalorder %s32_s18, %s301_s21  ;;  %p307_p7 = scmp.lt.s32.totalorder %s301_s21, %s301_s21 }
  0x15   :  { %p308_p8 = por %p307_p7, %p306_p6 }
  0x17   :  { %p309_p9 = pnand %p308_p8, %p302_p5 }
  0x19   :  { %312 = shalt.err (!%p309_p9)
}
  0x1a   :  { %34 = dma.hbm_to_vmem [thread:$0]  %s399_s2, 128, %s32_s18, [#allocation8]  }
  0x1b   :  { %335 = dma.done.wait [#allocation5], 32  }
  0x1c   :  { %336 = vsyncadd [#allocation5], 4294967264 }
  0x1d   :  { %337 = dma.done.wait [#allocation8], 128  }
  0x1e   :  { %338 = vsyncadd [#allocation8], 4294967168  ;;  %v344_v0 = vmov 0.0   ;;  %vm345_vm0 = vmmov 0   ;;  %vm66_vm1 = vcmask 785408   ;;  %v65_v1 = vld [vmem:[#allocation7] sm:$0xff] }
  0x1f   :  { %254 = vmatprep.subr.mxu0 %v344_v0  ;;  %256 = vmatprep.mubr.msk.f32.mxu0 %vm345_vm0, %v344_v0  ;;  %v41_v2 = vld [vmem:[#allocation4] sm:$0x3]  ;;  %s241_s1 = sld [smem:[#allocation3 + $0xe]]  ;;  %s346_s18 = smov [#allocation9]   ;;  %vm210_vm2 = vcmask 57344  }
  0x20   :  { %255 = vmatpush3.xpose.msk.msra.mxu0 %vm66_vm1, %v65_v1  ;;  %s242_s24 = sld [smem:[#allocation3 + $0xf]]  ;;  %s218_s19 = sshll.u32 %s346_s18, 4  ;;  %s219_s19 = int_to_ptr.vmem [resolvable:$true] %s218_s19 }
  0x21   :  { %s229_s25 = sld [smem:[#allocation3 + $0x2]]  ;;  %s313_s0 = scalar_lea.vmem %s219_s19, 16 }
  0x22   :  { %s230_s26 = sld [smem:[#allocation3 + $0x3]]  ;;  %p314_p10 = scmp.ne.s32.totalorder %s219_s19, %s313_s0 }
  0x23   :  { %257 = vmatmul.mubr.msk.f32.vlgmr.msra.gmra.mxu0 %vm66_vm1, %v41_v2  ;;  %s42_s27 = sld [smem:[#allocation3]]  ;;  %s317_s20 = scalar_lea.vmem %s219_s19, 32 }
  0x24   :  { %s228_s28 = sld [smem:[#allocation3 + $0x1]]  ;;  %p318_p11 = scmp.lt.s32.totalorder %s219_s19, %s219_s19 }
  0x25   :  { %v143_v3 = vstv %s241_s1  ;;  %s243_s2 = sld [smem:[#allocation3 + $0x10]]  ;;  %p319_p12 = scmp.lt.s32.totalorder %s317_s20, %s313_s0 }
  0x26   :  { %v146_v4 = vstv %s242_s24  ;;  %s244_s29 = sld [smem:[#allocation3 + $0x11]] }
  0x27   :  { %s376_s30 = sld [smem:[#allocation3 + $0x4]]  ;;  %v151_v8 = vstv %s229_s25  ;;  %p320_p13 = por %p319_p12, %p318_p11 }
  0x28   :  { %s378_s4 = sld [smem:[#allocation3 + $0x5]]  ;;  %v162_v9 = vstv %s230_s26 }
  0x29   :  { %s380_s5 = sld [smem:[#allocation3 + $0x6]]  ;;  %v149_v13 = vstv %s42_s27  ;;  %p321_p0 = pnand %p320_p13, %p314_p10 }
  0x2a   :  { %s234_s6 = sld [smem:[#allocation3 + $0x7]]  ;;  %v160_v14 = vstv %s228_s28 }
  0x2b   :  { %s382_s7 = sld [smem:[#allocation3 + $0x12]]  ;;  %v157_v21 = vstv %s243_s2 }
  0x2c   :  { %s246_s8 = sld [smem:[#allocation3 + $0x13]]  ;;  %v168_v22 = vstv %s244_s29 }
  0x2d   :  { %s384_s9 = sld [smem:[#allocation3 + $0x8]]  ;;  %v171_v27 = vstv %s376_s30 }
  0x2e   :  { %s386_s10 = sld [smem:[#allocation3 + $0x9]]  ;;  %v179_v29 = vstv %s378_s4 }
  0x2f   :  { %s237_s11 = sld [smem:[#allocation3 + $0xa]]  ;;  %v173_v28 = vstv %s380_s5 }
  0x30   :  { %v181_v30 = vstv %s234_s6  ;;  %s238_s12 = sld [smem:[#allocation3 + $0xb]] }
  0x31   :  { %s247_s13 = sld [smem:[#allocation3 + $0x14]]  ;;  %v176_v37 = vstv %s382_s7 }
  0x32   :  { %v184_v38 = vstv %s246_s8  ;;  %s248_s14 = sld [smem:[#allocation3 + $0x15]] }
  0x33   :  { %s239_s15 = sld [smem:[#allocation3 + $0xc]]  ;;  %v187_v43 = vstv %s384_s9 }
  0x34   :  { %s240_s16 = sld [smem:[#allocation3 + $0xd]]  ;;  %v195_v45 = vstv %s386_s10 }
  0x35   :  { %v189_v44 = vstv %s237_s11  ;;  %s249_s17 = sld [smem:[#allocation3 + $0x16]] }
  0x36   :  { %v197_v46 = vstv %s238_s12 }
  0x37   :  { %v192_v53 = vstv %s247_s13 }
  0x38   :  { %v200_v54 = vstv %s248_s14 }
  0x39   :  { %v203_v59 = vstv %s239_s15 }
  0x3a   :  { %v205_v60 = vstv %s240_s16 }
  0x3b   :  { %v208_v1 = vstv %s249_s17 }
  0xe3   :  { %v139_v5 = vpop.f32.mrf.mxu0 }
  0xe4   :  { %v144_v6 = vadd.f32 %v143_v3, %v139_v5  ;;  %v147_v7 = vadd.f32 %v146_v4, %v139_v5 }
  0xe5   :  { %v258_v10 = vpop.f32.mrf.mxu0 }
  0xe6   :  { %v145_v11 = vmax.f32 %v144_v6, 0.0  ;;  %v148_v12 = vmax.f32 %v147_v7, 0.0 }
  0xe8   :  { %v152_v15 = vmul.f32 %v151_v8, %v148_v12  ;;  %v163_v16 = vmul.f32 %v162_v9, %v148_v12  ;;  %v150_v17 = vmul.f32 %v149_v13, %v145_v11  ;;  %v161_v19 = vmul.f32 %v160_v14, %v145_v11 }
  0xea   :  { %v154_v18 = vrot.slane %v152_v15, 1  ;;  %v165_v20 = vrot.slane %v163_v16, 1 }
  0xec   :  { %v156_v23 = vadd.f32 %v154_v18, %v150_v17  ;;  %v167_v24 = vadd.f32 %v165_v20, %v161_v19 }
  0xee   :  { %v158_v25 = vadd.f32 %v157_v21, %v156_v23  ;;  %v169_v26 = vadd.f32 %v168_v22, %v167_v24 }
  0xf0   :  { %v159_v31 = vmax.f32 %v158_v25, 0.0  ;;  %v170_v32 = vmax.f32 %v169_v26, 0.0 }
  0xf2   :  { %v172_v33 = vmul.f32 %v171_v27, %v159_v31  ;;  %v174_v34 = vmul.f32 %v173_v28, %v170_v32  ;;  %v180_v35 = vmul.f32 %v179_v29, %v159_v31  ;;  %v182_v36 = vmul.f32 %v181_v30, %v170_v32 }
  0xf4   :  { %v175_v39 = vadd.f32 %v174_v34, %v172_v33  ;;  %v183_v40 = vadd.f32 %v182_v36, %v180_v35 }
  0xf6   :  { %v177_v41 = vadd.f32 %v176_v37, %v175_v39  ;;  %v185_v42 = vadd.f32 %v184_v38, %v183_v40 }
  0xf8   :  { %v178_v47 = vmax.f32 %v177_v41, 0.0  ;;  %v186_v48 = vmax.f32 %v185_v42, 0.0 }
  0xfa   :  { %v188_v49 = vmul.f32 %v187_v43, %v178_v47  ;;  %v190_v50 = vmul.f32 %v189_v44, %v186_v48  ;;  %v196_v51 = vmul.f32 %v195_v45, %v178_v47  ;;  %v198_v52 = vmul.f32 %v197_v46, %v186_v48 }
  0xfc   :  { %v191_v55 = vadd.f32 %v190_v50, %v188_v49  ;;  %v199_v56 = vadd.f32 %v198_v52, %v196_v51 }
  0xfe   :  { %v193_v57 = vadd.f32 %v192_v53, %v191_v55  ;;  %v201_v58 = vadd.f32 %v200_v54, %v199_v56 }
 0x100   :  { %v194_v61 = vmax.f32 %v193_v57, 0.0  ;;  %v202_v62 = vmax.f32 %v201_v58, 0.0 }
 0x102   :  { %v204_v63 = vmul.f32 %v203_v59, %v194_v61  ;;  %v206_v0 = vmul.f32 %v205_v60, %v202_v62 }
 0x104   :  { %v207_v2 = vadd.f32 %v206_v0, %v204_v63 }
 0x106   :  { %v209_v3 = vadd.f32 %v208_v1, %v207_v2 }
 0x108   :  { %211 = vst.msk [vmem:[#allocation9] sm:$0x1] %vm210_vm2, %v209_v3 }
 0x109   :  { %324 = shalt.err (!%p321_p0)
}
 0x10a   :  { %221 = dma.vmem_to_hbm [thread:$0]  %s219_s19, 16, %s400_s3, [#allocation6]  }
 0x10b   :  { %339 = dma.done.wait [#allocation6], 16  }
 0x10c   :  { %340 = vsyncadd [#allocation6], 4294967280 }
 0x10d   :  { %225 = vsyncpa [#allocation5], 1 }
 0x10e   :  { %226 = vsyncpa [#allocation8], 1 }
 0x10f   :  { %227 = vsyncpa [#allocation6], 1 }

</bundles_post_ra>
